<compile_context>
chip_gen: v7x
topology: tpu7x:2x2x1
jax: 0.10.0
libtpu: 0.0.40
codegen_flags: <defaults>
</compile_context>

<pallas_src>
import jax
import jax.numpy as jnp
from jax.experimental import pallas as pl
from jax.experimental.pallas import tpu as pltpu

LANES = 128  # TPU vreg lane width; all in-kernel params/activations padded to this.


# --------------------------- parameter packing --------------------------------

def _pack_param_slab(params, d_data, d_pds, n_data, n_pds):
    """Pack every weight/bias/query into ONE zero-padded f32 (R, 128) slab.

    Weights whose contraction dim feeds from a 128-wide padded activation are
    zero-padded to 128 rows; every entry starts on an 8-row (sublane) boundary.
    Returns (slab, offsets, R) with offsets[name] = (row_offset, rows_to_load).
    """
    f32 = jnp.float32
    ed, ep = params["encoder_data"], params["encoder_pds"]
    dd, dp = params["decoder_data"], params["decoder_pds"]

    entries = [  # (name, array, rows the kernel will load)
        ("ed_w1", ed["w1"], d_data), ("ed_b1", ed["b1"], 1),
        ("ed_w2", ed["w2"], LANES),  ("ed_b2", ed["b2"], 1),
        ("ep_w1", ep["w1"], d_pds),  ("ep_b1", ep["b1"], 1),
        ("ep_w2", ep["w2"], LANES),  ("ep_b2", ep["b2"], 1),
        ("dd_q",  dd["queries"], n_data),
        ("dd_w1", dd["w1"], LANES),  ("dd_b1", dd["b1"], 1),
        ("dd_w2", dd["w2"], LANES),  ("dd_b2", dd["b2"], 1),
        ("dp_q",  dp["queries"], n_pds),
        ("dp_w1", dp["w1"], LANES),  ("dp_b1", dp["b1"], 1),
        ("dp_w2", dp["w2"], LANES),  ("dp_b2", dp["b2"], 1),
    ]
    blocks, offsets, off = [], {}, 0
    for name, arr, load_rows in entries:
        r, c = arr.shape
        assert c <= LANES and r <= LANES and load_rows >= r
        store_rows = ((load_rows + 7) // 8) * 8
        blocks.append(jnp.pad(arr.astype(f32),
                              ((0, store_rows - r), (0, LANES - c))))
        offsets[name] = (off, load_rows)
        off += store_rows
    return jnp.concatenate(blocks, axis=0), offsets, off


# ------------------------------- fused kernel ---------------------------------

def _make_kernel(offsets, n_data, n_pds):
    f32 = jnp.float32

    def kernel(x_ref, pds_ref, mask_ref, p_ref, out_ref):
        def P(name):                       # static (zero-cost) slice of the slab
            off, rows = offsets[name]
            return p_ref[off:off + rows, :]

        x = x_ref[0]                       # (n_data, d_data)
        pd = pds_ref[0]                    # (n_pds, d_pds)
        m = mask_ref[0]                    # (n_pds, 1)

        # ---- encoder_pds: Linear -> ReLU -> masked mean pool -> Linear -------
        h = jnp.maximum(
            jnp.dot(pd, P("ep_w1"), preferred_element_type=f32) + P("ep_b1"), 0.0)
        cnt = jnp.maximum(jnp.sum(m, axis=0, keepdims=True), 1.0)        # (1,1)
        pooled = jnp.sum(h * m, axis=0, keepdims=True) / cnt             # (1,128)
        z_enc_pds = jnp.dot(pooled, P("ep_w2"),
                            preferred_element_type=f32) + P("ep_b2")     # (1,128)

        # ---- encoder_data: dumb all-ones mask -> plain mean pool -------------
        h = jnp.maximum(
            jnp.dot(x, P("ed_w1"), preferred_element_type=f32) + P("ed_b1"), 0.0)
        pooled = jnp.sum(h, axis=0, keepdims=True) * (1.0 / n_data)
        z_enc_data = jnp.dot(pooled, P("ed_w2"),
                             preferred_element_type=f32) + P("ed_b2")    # (1,128)

        # latent = z_enc_pds is shared by BOTH decoders (exactly as in PyTorch).
        latent = z_enc_pds

        # ---- decoder_pds + fused softplus / channel-select / mask epilogue ---
        d_in = P("dp_q") + latent                                        # (n_pds,128)
        h = jnp.maximum(
            jnp.dot(d_in, P("dp_w1"), preferred_element_type=f32) + P("dp_b1"), 0.0)
        y = jnp.dot(h, P("dp_w2"), preferred_element_type=f32) + P("dp_b2")
        # torch.nn.Softplus (beta=1, threshold=20): stable log1p-style form.
        sp = jnp.where(y > 20.0, y,
                       jnp.maximum(y, 0.0) + jnp.log(1.0 + jnp.exp(-jnp.abs(y))))
        ch = jax.lax.broadcasted_iota(jnp.int32, y.shape, 1) < 2
        res = jnp.where(ch, sp, y) * m                                   # * full_mask

        # ---- decoder_data ------------------------------------------------------
        d_in = P("dd_q") + latent                                        # (n_data,128)
        h = jnp.maximum(
            jnp.dot(d_in, P("dd_w1"), preferred_element_type=f32) + P("dd_b1"), 0.0)
        z_pic = jnp.dot(h, P("dd_w2"), preferred_element_type=f32) + P("dd_b2")

        # ---- single lane-dense output slab: [res | z_pic | z_enc_pds | z_enc_data]
        out_ref[0, 0:n_pds, :] = res
        out_ref[0, n_pds:n_pds + n_data, :] = z_pic
        out_ref[0, n_pds + n_data:n_pds + n_data + 1, :] = z_enc_pds
        out_ref[0, n_pds + n_data + 1:n_pds + n_data + 2, :] = z_enc_data

    return kernel


# -------------------------------- forward -------------------------------------

def pdnet_orbit5k_forward(X, pds, mask, params):
    """Mirrors PDNetOrbit5k.forward: returns (z_pic, res*full_mask, z_enc_pds, z_enc_data)."""
    f32 = jnp.float32
    B, n_data, d_data = X.shape
    _, n_pds, d_pds = pds.shape
    L = params["encoder_pds"]["w2"].shape[1]
    O_pds = params["decoder_pds"]["w2"].shape[1]
    O_data = params["decoder_data"]["w2"].shape[1]

    slab, offsets, R = _pack_param_slab(params, d_data, d_pds, n_data, n_pds)
    kernel = _make_kernel(offsets, n_data, n_pds)

    n_rows = n_pds + n_data + 2
    out = pl.pallas_call(
        kernel,
        out_shape=jax.ShapeDtypeStruct((B, n_rows, LANES), f32),
        grid=(B,),
        in_specs=[
            pl.BlockSpec((1, n_data, d_data), lambda b: (b, 0, 0)),
            pl.BlockSpec((1, n_pds, d_pds), lambda b: (b, 0, 0)),
            pl.BlockSpec((1, n_pds, 1), lambda b: (b, 0, 0)),
            pl.BlockSpec((R, LANES), lambda b: (0, 0)),   # params: fetched once, resident
        ],
        out_specs=pl.BlockSpec((1, n_rows, LANES), lambda b: (b, 0, 0)),
        # Batch items are independent -> shard the grid axis across TensorCores
        # (v7x megacore).  Per-step VMEM is <1 MiB, defaults are plenty; set
        # vmem_limit_bytes only when point counts grow into the MiB range.
        compiler_params=pltpu.CompilerParams(dimension_semantics=("parallel",)),
    )(X.astype(f32), pds.astype(f32), mask.astype(f32)[:, :, None], slab)

    res = out[:, :n_pds, :O_pds]
    z_pic = out[:, n_pds:n_pds + n_data, :O_data]
    z_enc_pds = out[:, n_pds + n_data, :L]
    z_enc_data = out[:, n_pds + n_data + 1, :L]
    return z_pic, res, z_enc_pds, z_enc_data


# ---------------------------- parameter setup ----------------------------------

def _linear_init(key, din, dout):
    kw, kb = jax.random.split(key)
    s = 1.0 / jnp.sqrt(jnp.float32(din))
    w = jax.random.uniform(kw, (din, dout), jnp.float32, -s, s)
    b = jax.random.uniform(kb, (1, dout), jnp.float32, -s, s)
    return w, b


def init_encoder(key, d_in, hidden, latent):
    k1, k2 = jax.random.split(key)
    w1, b1 = _linear_init(k1, d_in, hidden)
    w2, b2 = _linear_init(k2, hidden, latent)
    return {"w1": w1, "b1": b1, "w2": w2, "b2": b2}


def init_decoder(key, latent, hidden, d_out, n_points):
    k1, k2, kq = jax.random.split(key, 3)
    w1, b1 = _linear_init(k1, latent, hidden)
    w2, b2 = _linear_init(k2, hidden, d_out)
    q = 0.1 * jax.random.normal(kq, (n_points, latent), jnp.float32)
    return {"queries": q, "w1": w1, "b1": b1, "w2": w2, "b2": b2}


# ---------------------------------- main ----------------------------------------

if __name__ == "__main__":
    B = 2
    N_DATA, D_DATA = 16, 2          # Orbit5k point clouds are 2-D point sets
    N_PDS, D_PDS = 8, 4             # persistence diagrams: (birth, death, dim one-hot)
    HIDDEN, LATENT = 32, 16
    O_PDS, O_DATA = 4, 2            # decoder_pds: 2 coords + 2 "dims"; decoder_data: 2-D points

    root = jax.random.PRNGKey(0)
    kx, kp, km, k1, k2, k3, k4 = jax.random.split(root, 7)

    X = jax.random.normal(kx, (B, N_DATA, D_DATA), jnp.float32)
    pds = jax.random.normal(kp, (B, N_PDS, D_PDS), jnp.float32)
    mask = (jax.random.uniform(km, (B, N_PDS)) > 0.3).astype(jnp.float32)
    mask = mask.at[:, 0].set(1.0)   # ensure at least one valid PD point per batch item

    params = {
        "encoder_data": init_encoder(k1, D_DATA, HIDDEN, LATENT),
        "encoder_pds": init_encoder(k2, D_PDS, HIDDEN, LATENT),
        "decoder_data": init_decoder(k3, LATENT, HIDDEN, O_DATA, N_DATA),
        "decoder_pds": init_decoder(k4, LATENT, HIDDEN, O_PDS, N_PDS),
    }

    fwd = jax.jit(pdnet_orbit5k_forward)
    z_pic, res, z_enc_pds, z_enc_data = fwd(X, pds, mask, params)
    jax.block_until_ready((z_pic, res, z_enc_pds, z_enc_data))

    assert z_pic.shape == (B, N_DATA, O_DATA)
    assert res.shape == (B, N_PDS, O_PDS)
    assert z_enc_pds.shape == (B, LATENT)
    assert z_enc_data.shape == (B, LATENT)
    # masked rows of res must be exactly zero
    assert bool(jnp.all(jnp.where(mask[:, :, None] == 0.0, res == 0.0, True)))

    print("KERNEL_OK")
</pallas_src>

<mosaic_0001>
module attributes {stable_mosaic.version = 11 : i64} {
  func.func @kernel(%arg0: i32, %arg1: memref<1x16x2xf32, #tpu.memory_space<vmem>>, %arg2: memref<1x8x4xf32, #tpu.memory_space<vmem>>, %arg3: memref<1x8x1xf32, #tpu.memory_space<vmem>>, %arg4: memref<872x128xf32, #tpu.memory_space<vmem>>, %arg5: memref<1x26x128xf32, #tpu.memory_space<vmem>>) attributes {dimension_semantics = [#tpu.dimension_semantics<parallel>], iteration_bounds = array<i64: 2>, scalar_prefetch = 0 : i64, scratch_operands = 0 : i64, tpu.core_type = #tpu.core_type<tc>, window_params = [{transform_indices = @transform_0, window_bounds = array<i64: 1, 16, 2>}, {transform_indices = @transform_1, window_bounds = array<i64: 1, 8, 4>}, {transform_indices = @transform_2, window_bounds = array<i64: 1, 8, 1>}, {pipeline_mode = #tpu.pipeline_mode<synchronous>, transform_indices = @transform_3, window_bounds = array<i64: 872, 128>}, {transform_indices = @transform_4, window_bounds = array<i64: 1, 26, 128>}]} {
    %c0 = arith.constant 0 : index
    %c0_0 = arith.constant 0 : index
    %c0_1 = arith.constant 0 : index
    %0 = vector.load %arg1[%c0, %c0_0, %c0_1] : memref<1x16x2xf32, #tpu.memory_space<vmem>>, vector<1x16x2xf32>
    %1 = vector.shape_cast %0 : vector<1x16x2xf32> to vector<16x2xf32>
    %c0_2 = arith.constant 0 : index
    %c0_3 = arith.constant 0 : index
    %c0_4 = arith.constant 0 : index
    %2 = vector.load %arg2[%c0_2, %c0_3, %c0_4] : memref<1x8x4xf32, #tpu.memory_space<vmem>>, vector<1x8x4xf32>
    %3 = vector.shape_cast %2 : vector<1x8x4xf32> to vector<8x4xf32>
    %c0_5 = arith.constant 0 : index
    %c0_6 = arith.constant 0 : index
    %c0_7 = arith.constant 0 : index
    %4 = vector.load %arg3[%c0_5, %c0_6, %c0_7] : memref<1x8x1xf32, #tpu.memory_space<vmem>>, vector<1x8x1xf32>
    %5 = vector.shape_cast %4 : vector<1x8x1xf32> to vector<8x1xf32>
    %c152 = arith.constant 152 : index
    %c0_8 = arith.constant 0 : index
    %6 = vector.load %arg4[%c152, %c0_8] : memref<872x128xf32, #tpu.memory_space<vmem>>, vector<4x128xf32>
    %cst = arith.constant dense<0.000000e+00> : vector<8x128xf32>
    %7 = tpu.matmul %3, %6, %cst {dimension_numbers = #tpu.dot_dimension_numbers<[1], [0], [0], [1], [0, 0, 1, 1], [], []>} : vector<8x4xf32>, vector<4x128xf32>, vector<8x128xf32> -> vector<8x128xf32>
    %c160 = arith.constant 160 : index
    %c0_9 = arith.constant 0 : index
    %8 = vector.load %arg4[%c160, %c0_9] : memref<872x128xf32, #tpu.memory_space<vmem>>, vector<1x128xf32>
    %9 = vector.broadcast %8 : vector<1x128xf32> to vector<8x128xf32>
    %10 = arith.addf %7, %9 : vector<8x128xf32>
    %cst_10 = arith.constant 0.000000e+00 : f32
    %11 = vector.broadcast %cst_10 : f32 to vector<8x128xf32>
    %12 = arith.maximumf %10, %11 : vector<8x128xf32>
    %cst_11 = arith.constant dense<0.000000e+00> : vector<1xf32>
    %13 = vector.multi_reduction <add>, %5, %cst_11 [0] : vector<8x1xf32> to vector<1xf32>
    %14 = vector.shape_cast %13 : vector<1xf32> to vector<1x1xf32>
    %cst_12 = arith.constant 1.000000e+00 : f32
    %15 = vector.broadcast %cst_12 : f32 to vector<1x1xf32>
    %16 = arith.maximumf %14, %15 : vector<1x1xf32>
    %17 = vector.broadcast %5 : vector<8x1xf32> to vector<8x128xf32>
    %18 = arith.mulf %12, %17 : vector<8x128xf32>
    %cst_13 = arith.constant dense<0.000000e+00> : vector<128xf32>
    %19 = vector.multi_reduction <add>, %18, %cst_13 [0] : vector<8x128xf32> to vector<128xf32>
    %20 = vector.shape_cast %19 : vector<128xf32> to vector<1x128xf32>
    %21 = vector.broadcast %16 : vector<1x1xf32> to vector<1x128xf32>
    %22 = arith.divf %20, %21 : vector<1x128xf32>
    %c168 = arith.constant 168 : index
    %c0_14 = arith.constant 0 : index
    %23 = vector.load %arg4[%c168, %c0_14] : memref<872x128xf32, #tpu.memory_space<vmem>>, vector<128x128xf32>
    %cst_15 = arith.constant dense<0.000000e+00> : vector<1x128xf32>
    %24 = tpu.matmul %22, %23, %cst_15 {dimension_numbers = #tpu.dot_dimension_numbers<[1], [0], [0], [1], [0, 0, 1, 1], [], []>} : vector<1x128xf32>, vector<128x128xf32>, vector<1x128xf32> -> vector<1x128xf32>
    %c296 = arith.constant 296 : index
    %c0_16 = arith.constant 0 : index
    %25 = vector.load %arg4[%c296, %c0_16] : memref<872x128xf32, #tpu.memory_space<vmem>>, vector<1x128xf32>
    %26 = arith.addf %24, %25 : vector<1x128xf32>
    %c0_17 = arith.constant 0 : index
    %c0_18 = arith.constant 0 : index
    %27 = vector.load %arg4[%c0_17, %c0_18] : memref<872x128xf32, #tpu.memory_space<vmem>>, vector<2x128xf32>
    %cst_19 = arith.constant dense<0.000000e+00> : vector<16x128xf32>
    %28 = tpu.matmul %1, %27, %cst_19 {dimension_numbers = #tpu.dot_dimension_numbers<[1], [0], [0], [1], [0, 0, 1, 1], [], []>} : vector<16x2xf32>, vector<2x128xf32>, vector<16x128xf32> -> vector<16x128xf32>
    %c8 = arith.constant 8 : index
    %c0_20 = arith.constant 0 : index
    %29 = vector.load %arg4[%c8, %c0_20] : memref<872x128xf32, #tpu.memory_space<vmem>>, vector<1x128xf32>
    %30 = vector.broadcast %29 : vector<1x128xf32> to vector<16x128xf32>
    %31 = arith.addf %28, %30 : vector<16x128xf32>
    %cst_21 = arith.constant 0.000000e+00 : f32
    %32 = vector.broadcast %cst_21 : f32 to vector<16x128xf32>
    %33 = arith.maximumf %31, %32 : vector<16x128xf32>
    %cst_22 = arith.constant dense<0.000000e+00> : vector<128xf32>
    %34 = vector.multi_reduction <add>, %33, %cst_22 [0] : vector<16x128xf32> to vector<128xf32>
    %35 = vector.shape_cast %34 : vector<128xf32> to vector<1x128xf32>
    %cst_23 = arith.constant 6.250000e-02 : f32
    %36 = vector.broadcast %cst_23 : f32 to vector<1x128xf32>
    %37 = arith.mulf %35, %36 : vector<1x128xf32>
    %c16 = arith.constant 16 : index
    %c0_24 = arith.constant 0 : index
    %38 = vector.load %arg4[%c16, %c0_24] : memref<872x128xf32, #tpu.memory_space<vmem>>, vector<128x128xf32>
    %cst_25 = arith.constant dense<0.000000e+00> : vector<1x128xf32>
    %39 = tpu.matmul %37, %38, %cst_25 {dimension_numbers = #tpu.dot_dimension_numbers<[1], [0], [0], [1], [0, 0, 1, 1], [], []>} : vector<1x128xf32>, vector<128x128xf32>, vector<1x128xf32> -> vector<1x128xf32>
    %c144 = arith.constant 144 : index
    %c0_26 = arith.constant 0 : index
    %40 = vector.load %arg4[%c144, %c0_26] : memref<872x128xf32, #tpu.memory_space<vmem>>, vector<1x128xf32>
    %41 = arith.addf %39, %40 : vector<1x128xf32>
    %c592 = arith.constant 592 : index
    %c0_27 = arith.constant 0 : index
    %42 = vector.load %arg4[%c592, %c0_27] : memref<872x128xf32, #tpu.memory_space<vmem>>, vector<8x128xf32>
    %43 = vector.broadcast %26 : vector<1x128xf32> to vector<8x128xf32>
    %44 = arith.addf %42, %43 : vector<8x128xf32>
    %c600 = arith.constant 600 : index
    %c0_28 = arith.constant 0 : index
    %45 = vector.load %arg4[%c600, %c0_28] : memref<872x128xf32, #tpu.memory_space<vmem>>, vector<128x128xf32>
    %cst_29 = arith.constant dense<0.000000e+00> : vector<8x128xf32>
    %46 = tpu.matmul %44, %45, %cst_29 {dimension_numbers = #tpu.dot_dimension_numbers<[1], [0], [0], [1], [0, 0, 1, 1], [], []>} : vector<8x128xf32>, vector<128x128xf32>, vector<8x128xf32> -> vector<8x128xf32>
    %c728 = arith.constant 728 : index
    %c0_30 = arith.constant 0 : index
    %47 = vector.load %arg4[%c728, %c0_30] : memref<872x128xf32, #tpu.memory_space<vmem>>, vector<1x128xf32>
    %48 = vector.broadcast %47 : vector<1x128xf32> to vector<8x128xf32>
    %49 = arith.addf %46, %48 : vector<8x128xf32>
    %cst_31 = arith.constant 0.000000e+00 : f32
    %50 = vector.broadcast %cst_31 : f32 to vector<8x128xf32>
    %51 = arith.maximumf %49, %50 : vector<8x128xf32>
    %c736 = arith.constant 736 : index
    %c0_32 = arith.constant 0 : index
    %52 = vector.load %arg4[%c736, %c0_32] : memref<872x128xf32, #tpu.memory_space<vmem>>, vector<128x128xf32>
    %cst_33 = arith.constant dense<0.000000e+00> : vector<8x128xf32>
    %53 = tpu.matmul %51, %52, %cst_33 {dimension_numbers = #tpu.dot_dimension_numbers<[1], [0], [0], [1], [0, 0, 1, 1], [], []>} : vector<8x128xf32>, vector<128x128xf32>, vector<8x128xf32> -> vector<8x128xf32>
    %c864 = arith.constant 864 : index
    %c0_34 = arith.constant 0 : index
    %54 = vector.load %arg4[%c864, %c0_34] : memref<872x128xf32, #tpu.memory_space<vmem>>, vector<1x128xf32>
    %55 = vector.broadcast %54 : vector<1x128xf32> to vector<8x128xf32>
    %56 = arith.addf %53, %55 : vector<8x128xf32>
    %cst_35 = arith.constant 2.000000e+01 : f32
    %57 = vector.broadcast %cst_35 : f32 to vector<8x128xf32>
    %58 = arith.cmpf ogt, %56, %57 : vector<8x128xf32>
    %cst_36 = arith.constant 0.000000e+00 : f32
    %59 = vector.broadcast %cst_36 : f32 to vector<8x128xf32>
    %60 = arith.maximumf %56, %59 : vector<8x128xf32>
    %61 = math.absf %56 : vector<8x128xf32>
    %cst_37 = arith.constant 0.000000e+00 : f32
    %62 = vector.broadcast %cst_37 : f32 to vector<8x128xf32>
    %63 = arith.subf %62, %61 : vector<8x128xf32>
    %64 = math.exp %63 : vector<8x128xf32>
    %cst_38 = arith.constant 1.000000e+00 : f32
    %65 = vector.broadcast %cst_38 : f32 to vector<8x128xf32>
    %66 = arith.addf %65, %64 : vector<8x128xf32>
    %67 = math.log %66 : vector<8x128xf32>
    %68 = arith.addf %60, %67 : vector<8x128xf32>
    %69 = arith.select %58, %56, %68 : vector<8x128xi1>, vector<8x128xf32>
    %70 = tpu.iota {dimensions = array<i32: 1>} : vector<8x128xi32>
    %c2_i32 = arith.constant 2 : i32
    %71 = vector.broadcast %c2_i32 : i32 to vector<8x128xi32>
    %72 = arith.cmpi slt, %70, %71 : vector<8x128xi32>
    %73 = arith.select %72, %69, %56 : vector<8x128xi1>, vector<8x128xf32>
    %74 = vector.broadcast %5 : vector<8x1xf32> to vector<8x128xf32>
    %75 = arith.mulf %73, %74 : vector<8x128xf32>
    %c304 = arith.constant 304 : index
    %c0_39 = arith.constant 0 : index
    %76 = vector.load %arg4[%c304, %c0_39] : memref<872x128xf32, #tpu.memory_space<vmem>>, vector<16x128xf32>
    %77 = vector.broadcast %26 : vector<1x128xf32> to vector<16x128xf32>
    %78 = arith.addf %76, %77 : vector<16x128xf32>
    %c320 = arith.constant 320 : index
    %c0_40 = arith.constant 0 : index
    %79 = vector.load %arg4[%c320, %c0_40] : memref<872x128xf32, #tpu.memory_space<vmem>>, vector<128x128xf32>
    %cst_41 = arith.constant dense<0.000000e+00> : vector<16x128xf32>
    %80 = tpu.matmul %78, %79, %cst_41 {dimension_numbers = #tpu.dot_dimension_numbers<[1], [0], [0], [1], [0, 0, 1, 1], [], []>} : vector<16x128xf32>, vector<128x128xf32>, vector<16x128xf32> -> vector<16x128xf32>
    %c448 = arith.constant 448 : index
    %c0_42 = arith.constant 0 : index
    %81 = vector.load %arg4[%c448, %c0_42] : memref<872x128xf32, #tpu.memory_space<vmem>>, vector<1x128xf32>
    %82 = vector.broadcast %81 : vector<1x128xf32> to vector<16x128xf32>
    %83 = arith.addf %80, %82 : vector<16x128xf32>
    %cst_43 = arith.constant 0.000000e+00 : f32
    %84 = vector.broadcast %cst_43 : f32 to vector<16x128xf32>
    %85 = arith.maximumf %83, %84 : vector<16x128xf32>
    %c456 = arith.constant 456 : index
    %c0_44 = arith.constant 0 : index
    %86 = vector.load %arg4[%c456, %c0_44] : memref<872x128xf32, #tpu.memory_space<vmem>>, vector<128x128xf32>
    %cst_45 = arith.constant dense<0.000000e+00> : vector<16x128xf32>
    %87 = tpu.matmul %85, %86, %cst_45 {dimension_numbers = #tpu.dot_dimension_numbers<[1], [0], [0], [1], [0, 0, 1, 1], [], []>} : vector<16x128xf32>, vector<128x128xf32>, vector<16x128xf32> -> vector<16x128xf32>
    %c584 = arith.constant 584 : index
    %c0_46 = arith.constant 0 : index
    %88 = vector.load %arg4[%c584, %c0_46] : memref<872x128xf32, #tpu.memory_space<vmem>>, vector<1x128xf32>
    %89 = vector.broadcast %88 : vector<1x128xf32> to vector<16x128xf32>
    %90 = arith.addf %87, %89 : vector<16x128xf32>
    %c0_47 = arith.constant 0 : index
    %c0_48 = arith.constant 0 : index
    %c0_49 = arith.constant 0 : index
    %91 = vector.load %arg5[%c0_47, %c0_48, %c0_49] : memref<1x26x128xf32, #tpu.memory_space<vmem>>, vector<1x8x128xf32>
    %92 = vector.shape_cast %91 : vector<1x8x128xf32> to vector<8x128xf32>
    %93 = vector.shape_cast %75 : vector<8x128xf32> to vector<1x8x128xf32>
    tpu.vector_store %arg5[%c0_47, %c0_48, %c0_49], %93 {strides = array<i32>} : memref<1x26x128xf32, #tpu.memory_space<vmem>>, vector<1x8x128xf32>,
    %c0_50 = arith.constant 0 : index
    %c8_51 = arith.constant 8 : index
    %c0_52 = arith.constant 0 : index
    %94 = vector.load %arg5[%c0_50, %c8_51, %c0_52] : memref<1x26x128xf32, #tpu.memory_space<vmem>>, vector<1x16x128xf32>
    %95 = vector.shape_cast %94 : vector<1x16x128xf32> to vector<16x128xf32>
    %96 = vector.shape_cast %90 : vector<16x128xf32> to vector<1x16x128xf32>
    tpu.vector_store %arg5[%c0_50, %c8_51, %c0_52], %96 {strides = array<i32>} : memref<1x26x128xf32, #tpu.memory_space<vmem>>, vector<1x16x128xf32>,
    %c0_53 = arith.constant 0 : index
    %c24 = arith.constant 24 : index
    %c0_54 = arith.constant 0 : index
    %97 = vector.load %arg5[%c0_53, %c24, %c0_54] : memref<1x26x128xf32, #tpu.memory_space<vmem>>, vector<1x1x128xf32>
    %98 = vector.shape_cast %97 : vector<1x1x128xf32> to vector<1x128xf32>
    %99 = vector.shape_cast %26 : vector<1x128xf32> to vector<1x1x128xf32>
    tpu.vector_store %arg5[%c0_53, %c24, %c0_54], %99 {strides = array<i32>} : memref<1x26x128xf32, #tpu.memory_space<vmem>>, vector<1x1x128xf32>,
    %c0_55 = arith.constant 0 : index
    %c25 = arith.constant 25 : index
    %c0_56 = arith.constant 0 : index
    %100 = vector.load %arg5[%c0_55, %c25, %c0_56] : memref<1x26x128xf32, #tpu.memory_space<vmem>>, vector<1x1x128xf32>
    %101 = vector.shape_cast %100 : vector<1x1x128xf32> to vector<1x128xf32>
    %102 = vector.shape_cast %41 : vector<1x128xf32> to vector<1x1x128xf32>
    tpu.vector_store %arg5[%c0_55, %c25, %c0_56], %102 {strides = array<i32>} : memref<1x26x128xf32, #tpu.memory_space<vmem>>, vector<1x1x128xf32>,
    return
  }
  func.func @transform_0(%arg0: i32) -> (i32, i32, i32) {
    %c0_i32 = arith.constant 0 : i32
    %c0_i32_0 = arith.constant 0 : i32
    %c0_i32_1 = arith.constant 0 : i32
    return %arg0, %c0_i32, %c0_i32_0 : i32, i32, i32
  }
  func.func @transform_1(%arg0: i32) -> (i32, i32, i32) {
    %c0_i32 = arith.constant 0 : i32
    %c0_i32_0 = arith.constant 0 : i32
    %c0_i32_1 = arith.constant 0 : i32
    return %arg0, %c0_i32, %c0_i32_0 : i32, i32, i32
  }
  func.func @transform_2(%arg0: i32) -> (i32, i32, i32) {
    %c0_i32 = arith.constant 0 : i32
    %c0_i32_0 = arith.constant 0 : i32
    %c0_i32_1 = arith.constant 0 : i32
    return %arg0, %c0_i32, %c0_i32_0 : i32, i32, i32
  }
  func.func @transform_3(%arg0: i32) -> (i32, i32) {
    %c0_i32 = arith.constant 0 : i32
    %c0_i32_0 = arith.constant 0 : i32
    %c0_i32_1 = arith.constant 0 : i32
    return %c0_i32, %c0_i32_0 : i32, i32
  }
  func.func @transform_4(%arg0: i32) -> (i32, i32, i32) {
    %c0_i32 = arith.constant 0 : i32
    %c0_i32_0 = arith.constant 0 : i32
    %c0_i32_1 = arith.constant 0 : i32
    return %arg0, %c0_i32, %c0_i32_0 : i32, i32, i32
  }
}

</mosaic_0001>

<bundles_post_ra>
// kernel: pdnet_orbit5k_forward.1
= control target key start
LH: loop header
LB: loop body
LE: loop exit
PB: predicated region body
PF: predicated region fallthrough
CT: control target
= control target key end

     0   :  { %s1683_s15 = smov 0   ;;  %s2098_s0 = inlined_call_operand.vmem [shape: f32[2,16,2], index: 0, kind: input, shape index: {}]   ;;  %s2099_s1 = inlined_call_operand.vmem [shape: f32[2,8,4], index: 1, kind: input, shape index: {}]   ;;  %s2100_s2 = inlined_call_operand.vmem [shape: f32[2,8,1], index: 2, kind: input, shape index: {}]   ;;  %s2101_s3 = inlined_call_operand.vmem [shape: f32[872,128], index: 3, kind: input, shape index: {}]   ;;  %s2102_s4 = inlined_call_operand.vmem [shape: f32[2,26,128], index: 4, kind: output, shape index: {}]  }
   0x1 LB: > { %s1112_s16 = sadd.s32 4294967295, %s1652_s15   ;;  %p1116_p0 = scmp.ge.s32.totalorder %s1652_s15, 1  ;;  %s1652_s15 = sphi %s1683_s15, %s14_s15  }
   0x2   : > { %p180_p1 = scmp.lt.s32.totalorder %s1652_s15, 3 }
   0x4   : > { %p181_p2 = pnand %p1116_p0, %p180_p1 }
   0x5   : > { %v236_v0 = vld [vmem:[%s2101_s3 + $0x98] sm:$0xf] (!%p181_p2)  ;;  %vm246_vm0 = vcmask (!%p181_p2), 1043456   ;;  %p214_p3 = scmp.lt.s32.totalorder (!%p181_p2), %s1112_s16, 1  ;;  %v1654_v1 = vmov (!%p181_p2), 0.0   ;;  %vm1655_vm1 = vmmov (!%p181_p2), 0  }
   0x6   : > { %184 = sbr.rel (%p181_p2) target bundleno = 936 (0x3a8), region = 36  ;;  %1247 = vmatprep.subr.mxu1 (!%p181_p2), %v1654_v1  ;;  %1249 = vmatprep.mubr.msk.f32.mxu1 (!%p181_p2), %vm1655_vm1, %v1654_v1  ;;  %v349_v2 = vld [vmem:[%s2101_s3 + $0xa8] sm:$0xff] (!%p181_p2)  ;;  %v350_v3 = vld [vmem:[%s2101_s3 + $0xb0] sm:$0xff] (!%p181_p2)  ;;  %v1656_v4 = vmov (!%p181_p2), 0   ;;  %v1657_v5 = vmov (!%p181_p2), 0.0|0.0   ;;  %vm242_vm2 = vcmask (!%p181_p2), 31744  }
   0x7   : > { %1248 = vmatpush3.msk.msra.mxu1 (!%p181_p2), %vm246_vm0, %v236_v0  ;;  %1639 = vset.pattern.permute.xlu0 (!%p181_p2), %v1656_v4  ;;  %vm321_vm3 = vcmask (!%p181_p2), 7168   ;;  %v1468_v6 = vpack.c.bf16 (!%p181_p2), %v350_v3, %v349_v2  ;;  %v351_v7 = vld [vmem:[%s2101_s3 + $0xb8] sm:$0xff] (!%p181_p2)  ;;  %v352_v8 = vld [vmem:[%s2101_s3 + $0xc0] sm:$0xff] (!%p181_p2)  ;;  %v353_v14 = vld [vmem:[%s2101_s3 + $0xc8] sm:$0xff] (!%p181_p2)  ;;  %vm449_vm4 = vcmask (!%p181_p2), 1041408   ;;  %vm442_vm5 = vcmask (!%p181_p2), 15360  }
   0x8   : > { %1467 = vmatprep.subr.bf16.mxu1 (!%p181_p2), %v1657_v5  ;;  %v1471_v13 = vpack.c.bf16 (!%p181_p2), %v352_v8, %v351_v7  ;;  %v354_v15 = vld [vmem:[%s2101_s3 + $0xd0] sm:$0xff] (!%p181_p2)  ;;  %v355_v23 = vld [vmem:[%s2101_s3 + $0xd8] sm:$0xff] (!%p181_p2)  ;;  %v356_v24 = vld [vmem:[%s2101_s3 + $0xe0] sm:$0xff] (!%p181_p2) }
   0x9   : > { %v1474_v18 = vpack.c.bf16 (!%p181_p2), %v354_v15, %v353_v14  ;;  %v1477_v25 = vpack.c.bf16 (!%p181_p2), %v356_v24, %v355_v23  ;;  %v357_v26 = vld [vmem:[%s2101_s3 + $0xe8] sm:$0xff] (!%p181_p2)  ;;  %v358_v27 = vld [vmem:[%s2101_s3 + $0xf0] sm:$0xff] (!%p181_p2)  ;;  %v359_v29 = vld [vmem:[%s2101_s3 + $0xf8] sm:$0xff] (!%p181_p2) }
   0xa   : > { %v1480_v28 = vpack.c.bf16 (!%p181_p2), %v358_v27, %v357_v26  ;;  %v360_v30 = vld [vmem:[%s2101_s3 + $0x100] sm:$0xff] (!%p181_p2)  ;;  %v361_v32 = vld [vmem:[%s2101_s3 + $0x108] sm:$0xff] (!%p181_p2)  ;;  %v362_v33 = vld [vmem:[%s2101_s3 + $0x110] sm:$0xff] (!%p181_p2) }
   0xb   : > { %v1483_v31 = vpack.c.bf16 (!%p181_p2), %v360_v30, %v359_v29  ;;  %v1486_v34 = vpack.c.bf16 (!%p181_p2), %v362_v33, %v361_v32  ;;  %v363_v35 = vld [vmem:[%s2101_s3 + $0x118] sm:$0xff] (!%p181_p2)  ;;  %v364_v36 = vld [vmem:[%s2101_s3 + $0x120] sm:$0xff] (!%p181_p2)  ;;  %v633_v60 = vld [vmem:[%s2101_s3 + $0x268] sm:$0xff] (!%p181_p2) }
   0xc   : > { %v1489_v37 = vpack.c.bf16 (!%p181_p2), %v364_v36, %v363_v35  ;;  %v436_v38 = vld [vmem:[%s2101_s3] sm:$0x3] (!%p181_p2)  ;;  %v631_v54 = vld [vmem:[%s2101_s3 + $0x258] sm:$0xff] (!%p181_p2)  ;;  %v634_v61 = vld [vmem:[%s2101_s3 + $0x270] sm:$0xff] (!%p181_p2) }
   0xd   : > { %s2104_s16 = smov (!%p214_p3, %s1112_s16), 1  ;;  %1287 = vmatprep.subr.msk.mxu0 %vm449_vm4, %v436_v38  ;;  %v1123_v41 = vld [vmem:[%s2101_s3 + $0xa0] ss:$0 sm:$0xff]  ;;  %v1519_v62 = vpack.c.bf16 %v634_v61, %v633_v60  ;;  %v635_v63 = vld [vmem:[%s2101_s3 + $0x278] sm:$0xff]  ;;  %v637_v3 = vld [vmem:[%s2101_s3 + $0x288] sm:$0xff] }
   0xe   : > { %s1119_s23 = sshll.u32 %s2104_s16, 3  ;;  %s1136_s10 = sshll.u32 %s2104_s16, 4  ;;  %1288 = vmatpush3.msk.msra.mxu0 %vm449_vm4, %v436_v38  ;;  %v632_v55 = vld [vmem:[%s2101_s3 + $0x260] sm:$0xff]  ;;  %v638_v4 = vld [vmem:[%s2101_s3 + $0x290] sm:$0xff]  ;;  %v639_v7 = vld [vmem:[%s2101_s3 + $0x298] sm:$0xff] }
   0xf   : > { %s222_s26 = scalar_lea.vmem %s2099_s1, %s1119_s23  ;;  %s226_s29 = scalar_lea.vmem %s2100_s2, %s1119_s23  ;;  %1491 = vmatprep.subr.bf16.mxu0 %v1657_v5  ;;  %v1516_v58 = vpack.c.bf16 %v632_v55, %v631_v54  ;;  %v636_v0 = vld [vmem:[%s2101_s3 + $0x280] sm:$0xff]  ;;  %v539_v23 = vld [vmem:[%s2101_s3 + $0x18] sm:$0xff]  ;;  %v541_v27 = vld [vmem:[%s2101_s3 + $0x28] sm:$0xff] }
  0x10   : > { %v234_v9 = vld [vmem:[%s222_s26] sm:$0xff]  ;;  %s218_s13 = scalar_lea.vmem %s2098_s0, %s1136_s10  ;;  %v1522_v2 = vpack.c.bf16 %v636_v0, %v635_v63  ;;  %v1126_v29 = vld [vmem:[%s2101_s3 + $0x8] ss:$0 sm:$0xff]  ;;  %v542_v33 = vld [vmem:[%s2101_s3 + $0x30] sm:$0xff]  ;;  %s1137_s20 = sshll.u32 %s2104_s16, 5 }
  0x11   : > { %v235_v10 = vld [vmem:[%s226_s29] sm:$0xff]  ;;  %1250 = vmatmul.mubr.msk.f32.vlgmr.msra.gmra.mrb[0].mxu1 %vm242_vm2, %v234_v9  ;;  %v233_v40 = vld [vmem:[%s218_s13 + $0x8] sm:$0xff]  ;;  %v551_v54 = vld [vmem:[%s2101_s3 + $0x78] sm:$0xff]  ;;  %s1965_s25 = scalar_lea.vmem %s2102_s4, %s1137_s20 }
  0x12   : > { %332 = vperm.xlu0 %1639, %v235_v10   ;;  %v322_v11 = vsel %vm321_vm3, %v235_v10, 0.0  ;;  %1469 = vmatpush3.bf16.msra.mxu1 %v1468_v6  ;;  %v232_v39 = vld [vmem:[%s218_s13] sm:$0xff]  ;;  %v1525_v6 = vpack.c.bf16 %v638_v4, %v637_v3  ;;  %v641_v10 = vld [vmem:[%s2101_s3 + $0x2a8] sm:$0xff]  ;;  %v726_v3 = vld [vmem:[%s2101_s3 + $0x2f8] sm:$0xff] }
  0x13   : > { %v323_v12 = vrot.slane %v322_v11, 4  ;;  %1284 = vmatprep.mubr.msk.f32.mxu1 %vm1655_vm1, %v1654_v1  ;;  %1470 = vmatprep.subr.bf16.mxu1 %v1657_v5  ;;  %v640_v8 = vld [vmem:[%s2101_s3 + $0x2a0] sm:$0xff] }
  0x14   : > { %1289 = vmatprep.mubr.msk.f32.mxu0 %vm442_vm5, %v232_v39  ;;  %v1528_v9 = vpack.c.bf16 %v640_v8, %v639_v7  ;;  %v644_v14 = vld [vmem:[%s2101_s3 + $0x2c0] sm:$0xff]  ;;  %v728_v7 = vld [vmem:[%s2101_s3 + $0x308] sm:$0xff] }
  0x15   : > { %v324_v16 = vadd.f32 %v323_v12, %v322_v11  ;;  %1290 = vmatmul.mubr.msk.f32.vlgmr.msra.gmra.mrb[0].mxu0 %vm442_vm5, %v233_v40  ;;  %v642_v11 = vld [vmem:[%s2101_s3 + $0x2b0] sm:$0xff]  ;;  %v540_v24 = vld [vmem:[%s2101_s3 + $0x20] sm:$0xff]  ;;  %v545_v40 = vld [vmem:[%s2101_s3 + $0x48] sm:$0xff] }
  0x16   : > { %1472 = vmatpush3.bf16.msra.mxu1 %v1471_v13  ;;  %1324 = vmatprep.mubr.msk.f32.mxu0 %vm1655_vm1, %v1654_v1  ;;  %v1531_v12 = vpack.c.bf16 %v642_v11, %v641_v10  ;;  %v643_v13 = vld [vmem:[%s2101_s3 + $0x2b8] sm:$0xff]  ;;  %v1495_v30 = vpack.c.bf16 %v541_v27, %v540_v24  ;;  %v544_v39 = vld [vmem:[%s2101_s3 + $0x40] sm:$0xff] }
  0x17   : > { %v325_v17 = vrot.slane %v324_v16, 2  ;;  %1473 = vmatprep.subr.bf16.mxu1 %v1657_v5  ;;  %v1534_v15 = vpack.c.bf16 %v644_v14, %v643_v13  ;;  %v723_v61 = vld [vmem:[%s2101_s3 + $0x2e0] sm:$0xff]  ;;  %v733_v14 = vld [vmem:[%s2101_s3 + $0x330] sm:$0xff] }
  0x18   : > { %v731_v11 = vld [vmem:[%s2101_s3 + $0x320] sm:$0xff] }
  0x19   : > { %v326_v19 = vadd.f32 %v325_v17, %v324_v16  ;;  %v645_v16 = vld [vmem:[%s2101_s3 + $0x2c8] sm:$0xff]  ;;  %v646_v17 = vld [vmem:[%s2101_s3 + $0x2d0] sm:$0xff] }
  0x1a   : > { %1475 = vmatpush3.bf16.msra.mxu1 %v1474_v18  ;;  %v1537_v18 = vpack.c.bf16 %v646_v17, %v645_v16  ;;  %v735_v17 = vld [vmem:[%s2101_s3 + $0x340] sm:$0xff] }
  0x1b   : > { %v327_v20 = vrot.slane %v326_v19, 1  ;;  %1476 = vmatprep.subr.bf16.mxu1 %v1657_v5 }
  0x1d   : > { %v328_v21 = vadd.f32 %v327_v20, %v326_v19  ;;  %v834_v19 = vld [vmem:[%s2101_s3 + $0x140] sm:$0xff]  ;;  %v835_v20 = vld [vmem:[%s2101_s3 + $0x148] sm:$0xff] }
  0x1e   : > { %1478 = vmatpush3.bf16.msra.mxu1 %v1477_v25 }
  0x1f   : > { %v329_v22 = vmax.f32 %v328_v21, 1.0  ;;  %1479 = vmatprep.subr.bf16.mxu1 %v1657_v5  ;;  %v1844_v21 = vpack.c.bf16 %v835_v20, %v834_v19  ;;  %v626_v20 = vlaneseq }
  0x21   : > { %344 = vperm.xlu0 %1639, %v329_v22   ;;  %v538_v22 = vld [vmem:[%s2101_s3 + $0x10] sm:$0xff] }
  0x22   : > { %1481 = vmatpush3.bf16.msra.mxu1 %v1480_v28  ;;  %v1492_v26 = vpack.c.bf16 %v539_v23, %v538_v22  ;;  %v627_v22 = vshrl.u32 %v626_v20, 7  ;;  %v365_v23 = vld [vmem:[%s2101_s3 + $0x128] sm:$0x1] }
  0x23   : > { %1482 = vmatprep.subr.bf16.mxu1 %v1657_v5 }
  0x24   : > { %1493 = vmatpush3.bf16.msra.mxu0 %v1492_v26  ;;  %v628_v24 = vsub.s32 0, %v627_v22  ;;  %v943_v22 = vld [vmem:[%s2101_s3 + $0x220] sm:$0xff] }
  0x25   : > { %1494 = vmatprep.subr.bf16.mxu0 %v1657_v5 }
  0x26   : > { %1484 = vmatpush3.bf16.msra.mxu1 %v1483_v31 }
  0x27   : > { %1485 = vmatprep.subr.bf16.mxu1 %v1657_v5 }
  0x28   : > { %1496 = vmatpush3.bf16.msra.mxu0 %v1495_v30  ;;  %v837_v30 = vld [vmem:[%s2101_s3 + $0x158] sm:$0xff] }
  0x29   : > { %1497 = vmatprep.subr.bf16.mxu0 %v1657_v5 }
  0x2a   : > { %1487 = vmatpush3.bf16.msra.mxu1 %v1486_v34  ;;  %v543_v34 = vld [vmem:[%s2101_s3 + $0x38] sm:$0xff] }
  0x2b   : > { %1488 = vmatprep.subr.bf16.mxu1 %v1657_v5 }
  0x2e   : > { %1490 = vmatpush3.bf16.msra.mxu1 %v1489_v37  ;;  %v1498_v37 = vpack.c.bf16 %v543_v34, %v542_v33 }
  0x2f   : > { %1515 = vmatprep.subr.bf16.mxu1 %v1657_v5 }
  0x30   : > { %1499 = vmatpush3.bf16.msra.mxu0 %v1498_v37 }
  0x31   : > { %1500 = vmatprep.subr.bf16.mxu0 %v1657_v5 }
  0x91   : > { %v1778_v42 = vpop.permute.xlu0 %332 }
  0xa0   : > { %v345_v48 = vpop.permute.xlu0 %344 }
  0xa1   : > { %1640 = vrcp.f32 %v345_v48 }
  0xab   : > { %v1641_v57 = vpop.eup %1640 }
  0xe4   : > { %v316_v43 = vpop.f32.mrb[0].mxu1 }
  0xe5   : > { %v317_v44 = vadd.f32 %v1123_v41, %v316_v43  ;;  %v1251_v45 = vpop.f32.mrb[1].mxu1 }
  0xe6   : > { %v546_v45 = vld [vmem:[%s2101_s3 + $0x50] sm:$0xff] }
  0xe7   : > { %v320_v46 = vmax.f32 %v317_v44, 0.0  ;;  %v1501_v44 = vpack.c.bf16 %v545_v40, %v544_v39  ;;  %v841_v39 = vld [vmem:[%s2101_s3 + $0x178] sm:$0xff] }
  0xe8   : > { %v1291_v25 = vpop.f32.mrb[0].mxu0 }
  0xe9   : > { %v335_v47 = vmul.f32 %v1778_v42, %v320_v46  ;;  %v519_v28 = vpop.f32.mrb[1].mxu0  ;;  %v525_v31 = vadd.f32 %v1291_v25, %v1126_v29  ;;  %v547_v46 = vld [vmem:[%s2101_s3 + $0x58] sm:$0xff]  ;;  %1502 = vmatpush3.bf16.msra.mxu0 %v1501_v44  ;;  %v844_v44 = vld [vmem:[%s2101_s3 + $0x190] sm:$0xff] }
  0xea   : > { %v520_v32 = vadd.f32 %v1126_v29, %v519_v28  ;;  %v1504_v48 = vpack.c.bf16 %v547_v46, %v546_v45  ;;  %1503 = vmatprep.subr.bf16.mxu0 %v1657_v5  ;;  %v830_v28 = vld [vmem:[%s2101_s3 + $0x130] sm:$0xff]  ;;  %v845_v45 = vld [vmem:[%s2101_s3 + $0x198] sm:$0xff] }
  0xeb   : > { %v336_v49 = vrot.slane %v335_v47, 4  ;;  %v529_v35 = vmax.f32 %v525_v31, 0.0  ;;  %v836_v29 = vld [vmem:[%s2101_s3 + $0x150] sm:$0xff]  ;;  %v1583_v46 = vpack.c.bf16 %v845_v45, %v844_v44  ;;  %v826_v45 = vand.u32 127, %v626_v20 }
  0xec   : > { %v528_v36 = vmax.f32 %v520_v32, 0.0  ;;  %v1567_v34 = vpack.c.bf16 %v837_v30, %v836_v29  ;;  %v1132_v29 = vld [vmem:[%s2101_s3 + $0x1c0] ss:$0 sm:$0xff] }
  0xed   : > { %v337_v50 = vadd.f32 %v336_v49, %v335_v47  ;;  %v548_v49 = vld [vmem:[%s2101_s3 + $0x60] sm:$0xff]  ;;  %1505 = vmatpush3.bf16.msra.mxu0 %v1504_v48  ;;  %v847_v48 = vld [vmem:[%s2101_s3 + $0x1a8] sm:$0xff]  ;;  %vm827_vm6 = vcmp.lt.s32.totalorder %v826_v45, 2 }
  0xee   : > { %v530_v38 = vadd.f32 %v529_v35, %v528_v36  ;;  %1506 = vmatprep.subr.bf16.mxu0 %v1657_v5  ;;  %v838_v35 = vld [vmem:[%s2101_s3 + $0x160] sm:$0xff]  ;;  %v839_v36 = vld [vmem:[%s2101_s3 + $0x168] sm:$0xff] }
  0xef   : > { %v338_v51 = vrot.slane %v337_v50, 2  ;;  %v1571_v37 = vpack.c.bf16 %v839_v36, %v838_v35  ;;  %v1131_v36 = vld [vmem:[%s2101_s3 + $0x360] ss:$0 sm:$0xff] }
  0xf0   : > { %v531_v41 = vrot.slane %v530_v38, 4 }
  0xf1   : > { %v339_v52 = vadd.f32 %v338_v51, %v337_v50  ;;  %v549_v50 = vld [vmem:[%s2101_s3 + $0x68] sm:$0xff] }
  0xf2   : > { %v532_v43 = vadd.f32 %v531_v41, %v530_v38  ;;  %v840_v38 = vld [vmem:[%s2101_s3 + $0x170] sm:$0xff]  ;;  %v842_v41 = vld [vmem:[%s2101_s3 + $0x180] sm:$0xff] }
  0xf3   : > { %v340_v53 = vrot.slane %v339_v52, 1  ;;  %v1575_v40 = vpack.c.bf16 %v841_v39, %v840_v38 }
  0xf4   : > { %v533_v47 = vrot.slane %v532_v43, 2 }
  0xf5   : > { %v341_v56 = vadd.f32 %v340_v53, %v339_v52  ;;  %v1507_v52 = vpack.c.bf16 %v549_v50, %v548_v49  ;;  %v550_v53 = vld [vmem:[%s2101_s3 + $0x70] sm:$0xff] }
  0xf6   : > { %v534_v51 = vadd.f32 %v533_v47, %v532_v43  ;;  %v846_v47 = vld [vmem:[%s2101_s3 + $0x1a0] sm:$0xff]  ;;  %v848_v50 = vld [vmem:[%s2101_s3 + $0x1b0] sm:$0xff] }
  0xf7   : > { %v348_v59 = vmul.f32 %v1641_v57, %v341_v56  ;;  %1508 = vmatpush3.bf16.msra.mxu0 %v1507_v52  ;;  %v1510_v56 = vpack.c.bf16 %v551_v54, %v550_v53  ;;  %v552_v57 = vld [vmem:[%s2101_s3 + $0x80] sm:$0xff]  ;;  %v1587_v49 = vpack.c.bf16 %v847_v48, %v846_v47  ;;  %v831_v53 = vld [vmem:[%s2101_s3 + $0x138] sm:$0xff]  ;;  %v1133_v47 = vld [vmem:[%s2101_s3 + $0x248] ss:$0 sm:$0xff] }
  0xf8   : > { %v535_v55 = vrot.slane %v534_v51, 1  ;;  %1509 = vmatprep.subr.bf16.mxu0 %v1657_v5 }
  0xf9   : > { %1285 = vmatmul.mubr.f32.vlgmr.msra.gmra.mrb[2].mxu1 %v348_v59 }
  0xfa   : > { %1517 = vmatpush3.bf16.msra.mxu1 %v1516_v58  ;;  %1359 = vmatprep.mubr.msk.f32.mxu1 %vm1655_vm1, %v1654_v1  ;;  %v553_v58 = vld [vmem:[%s2101_s3 + $0x88] sm:$0xff]  ;;  %v536_v59 = vadd.f32 %v535_v55, %v534_v51  ;;  %v849_v51 = vld [vmem:[%s2101_s3 + $0x1b8] sm:$0xff]  ;;  %v737_v55 = vld [vmem:[%s2101_s3 + $0x350] sm:$0xff] }
  0xfb   : > { %1518 = vmatprep.subr.bf16.mxu1 %v1657_v5  ;;  %1511 = vmatpush3.bf16.msra.mxu0 %v1510_v56  ;;  %v1513_v60 = vpack.c.bf16 %v553_v58, %v552_v57  ;;  %v1591_v52 = vpack.c.bf16 %v849_v51, %v848_v50  ;;  %v738_v56 = vld [vmem:[%s2101_s3 + $0x358] sm:$0xff]  ;;  %v932_v58 = vld [vmem:[%s2101_s3 + $0x1c8] sm:$0xff] }
  0xfc   : > { %1512 = vmatprep.subr.bf16.mxu0 %v1657_v5  ;;  %v537_v63 = vmul.f32 0.0625, %v536_v59  ;;  %v1561_v57 = vpack.c.bf16 %v738_v56, %v737_v55  ;;  %v933_v59 = vld [vmem:[%s2101_s3 + $0x1d0] sm:$0xff] }
  0xfe   : > { %1520 = vmatpush3.bf16.msra.mxu1 %v1519_v62  ;;  %v724_v62 = vld [vmem:[%s2101_s3 + $0x2e8] sm:$0xff] }
  0xff   : > { %1521 = vmatprep.subr.bf16.mxu1 %v1657_v5  ;;  %1514 = vmatpush3.bf16.msra.mxu0 %v1513_v60  ;;  %v1540_v0 = vpack.c.bf16 %v724_v62, %v723_v61  ;;  %v1595_v60 = vpack.c.bf16 %v933_v59, %v932_v58  ;;  %v554_v61 = vld [vmem:[%s2101_s3 + $0x90] sm:$0x1] }
 0x100   : > { %1539 = vmatprep.subr.bf16.mxu0 %v1657_v5 }
 0x102   : > { %1523 = vmatpush3.bf16.msra.mxu1 %v1522_v2  ;;  %v725_v2 = vld [vmem:[%s2101_s3 + $0x2f0] sm:$0xff]  ;;  %1325 = vmatmul.mubr.f32.vlgmr.msra.gmra.mrb[2].mxu0 %v537_v63 }
 0x103   : > { %1524 = vmatprep.subr.bf16.mxu1 %v1657_v5  ;;  %1541 = vmatpush3.bf16.msra.mxu0 %v1540_v0  ;;  %v1543_v4 = vpack.c.bf16 %v726_v3, %v725_v2  ;;  %v1130_v2 = vld [vmem:[%s2101_s3 + $0x2d8] ss:$0 sm:$0xff] }
 0x104   : > { %1394 = vmatprep.mubr.msk.f32.mxu0 %vm1655_vm1, %v1654_v1  ;;  %1542 = vmatprep.subr.bf16.mxu0 %v1657_v5  ;;  %v730_v1 = vld [vmem:[%s2101_s3 + $0x318] sm:$0xff] }
 0x106   : > { %1526 = vmatpush3.bf16.msra.mxu1 %v1525_v6  ;;  %v727_v6 = vld [vmem:[%s2101_s3 + $0x300] sm:$0xff] }
 0x107   : > { %1527 = vmatprep.subr.bf16.mxu1 %v1657_v5  ;;  %1544 = vmatpush3.bf16.msra.mxu0 %v1543_v4  ;;  %v1546_v8 = vpack.c.bf16 %v728_v7, %v727_v6  ;;  %v934_v4 = vld [vmem:[%s2101_s3 + $0x1d8] sm:$0xff]  ;;  %v935_v6 = vld [vmem:[%s2101_s3 + $0x1e0] sm:$0xff] }
 0x108   : > { %1545 = vmatprep.subr.bf16.mxu0 %v1657_v5 }
 0x10a   : > { %1529 = vmatpush3.bf16.msra.mxu1 %v1528_v9  ;;  %v729_v9 = vld [vmem:[%s2101_s3 + $0x310] sm:$0xff] }
 0x10b   : > { %1530 = vmatprep.subr.bf16.mxu1 %v1657_v5  ;;  %1547 = vmatpush3.bf16.msra.mxu0 %v1546_v8  ;;  %v1549_v10 = vpack.c.bf16 %v730_v1, %v729_v9  ;;  %v1599_v1 = vpack.c.bf16 %v935_v6, %v934_v4 }
 0x10c   : > { %1548 = vmatprep.subr.bf16.mxu0 %v1657_v5 }
 0x10e   : > { %1532 = vmatpush3.bf16.msra.mxu1 %v1531_v12  ;;  %v732_v12 = vld [vmem:[%s2101_s3 + $0x328] sm:$0xff] }
 0x10f   : > { %1533 = vmatprep.subr.bf16.mxu1 %v1657_v5  ;;  %1550 = vmatpush3.bf16.msra.mxu0 %v1549_v10  ;;  %v1552_v13 = vpack.c.bf16 %v732_v12, %v731_v11  ;;  %v936_v10 = vld [vmem:[%s2101_s3 + $0x1e8] sm:$0xff]  ;;  %v937_v11 = vld [vmem:[%s2101_s3 + $0x1f0] sm:$0xff] }
 0x110   : > { %1551 = vmatprep.subr.bf16.mxu0 %v1657_v5  ;;  %v1603_v12 = vpack.c.bf16 %v937_v11, %v936_v10 }
 0x112   : > { %1535 = vmatpush3.bf16.msra.mxu1 %v1534_v15  ;;  %v734_v15 = vld [vmem:[%s2101_s3 + $0x338] sm:$0xff] }
 0x113   : > { %1536 = vmatprep.subr.bf16.mxu1 %v1657_v5  ;;  %1553 = vmatpush3.bf16.msra.mxu0 %v1552_v13  ;;  %v1555_v16 = vpack.c.bf16 %v734_v15, %v733_v14  ;;  %v938_v13 = vld [vmem:[%s2101_s3 + $0x1f8] sm:$0xff]  ;;  %v939_v14 = vld [vmem:[%s2101_s3 + $0x200] sm:$0xff] }
 0x114   : > { %1554 = vmatprep.subr.bf16.mxu0 %v1657_v5  ;;  %v1607_v15 = vpack.c.bf16 %v939_v14, %v938_v13 }
 0x116   : > { %1538 = vmatpush3.bf16.msra.mxu1 %v1537_v18  ;;  %v736_v18 = vld [vmem:[%s2101_s3 + $0x348] sm:$0xff] }
 0x117   : > { %1564 = vmatprep.subr.bf16.mxu1 %v1844_v21  ;;  %1556 = vmatpush3.bf16.msra.mxu0 %v1555_v16  ;;  %v1558_v19 = vpack.c.bf16 %v736_v18, %v735_v17  ;;  %v940_v16 = vld [vmem:[%s2101_s3 + $0x208] sm:$0xff]  ;;  %v941_v17 = vld [vmem:[%s2101_s3 + $0x210] sm:$0xff] }
 0x118   : > { %1557 = vmatprep.subr.bf16.mxu0 %v1657_v5  ;;  %v1611_v18 = vpack.c.bf16 %v941_v17, %v940_v16 }
 0x11b   : > { %1559 = vmatpush3.bf16.msra.mxu0 %v1558_v19  ;;  %v942_v19 = vld [vmem:[%s2101_s3 + $0x218] sm:$0xff] }
 0x11c   : > { %1560 = vmatprep.subr.bf16.mxu0 %v1657_v5  ;;  %v625_v5 = vld [vmem:[%s2101_s3 + $0x250] sm:$0xff] }
 0x11f   : > { %1562 = vmatpush3.bf16.msra.mxu0 %v1561_v57 }
 0x120   : > { %1596 = vmatprep.subr.bf16.mxu0 %v1595_v60 }
 0x1cc   : > { %v432_v25 = vpop.f32.mrb[2].mxu1 }
 0x1cd   : > { %v433_v26 = vadd.f32 %v432_v25, %v365_v23  ;;  %v1286_v27 = vpop.f32.mrb[3].mxu1  ;;  %v1615_v23 = vpack.c.bf16 %v943_v22, %v942_v19  ;;  %v945_v25 = vld [vmem:[%s2101_s3 + $0x230] sm:$0xff] }
 0x1ce   : > { %v947_v27 = vld [vmem:[%s2101_s3 + $0x240] sm:$0xff] }
 0x1cf   : > { %v629_v31 = vrot.slane %v433_v26, %v628_v24  ;;  %1031 = vst [vmem:[%s1965_s25 + $0x18] sm:$0x1] %v433_v26  ;;  %v944_v24 = vld [vmem:[%s2101_s3 + $0x228] sm:$0xff] }
 0x1d0   : > { %v1619_v26 = vpack.c.bf16 %v945_v25, %v944_v24 }
 0x1d1   : > { %v630_v32 = vadd.f32 %v629_v31, %v625_v5  ;;  %v832_v33 = vadd.f32 %v830_v28, %v629_v31  ;;  %v833_v54 = vadd.f32 %v831_v53, %v629_v31  ;;  %v946_v5 = vld [vmem:[%s2101_s3 + $0x238] sm:$0xff] }
 0x1d2   : > { %v1623_v28 = vpack.c.bf16 %v947_v27, %v946_v5 }
 0x1d3   : > { %1360 = vmatmul.mubr.f32.vlgmr.msra.gmra.mrb[4].mxu1 %v630_v32 }
 0x1d4   : > { %1566 = vmatpush3.bf16.msra.mxu1 %v1844_v21  ;;  %1429 = vmatprep.mubr.f32.mxu1 %v832_v33  ;;  %v843_v21 = vld [vmem:[%s2101_s3 + $0x188] sm:$0xff] }
 0x1d5   : > { %1568 = vmatprep.subr.bf16.mxu1 %v1567_v34  ;;  %v1579_v43 = vpack.c.bf16 %v843_v21, %v842_v41  ;;  %v621_v62 = vpop.f32.mrb[2].mxu0 }
 0x1d6   : > { %v622_v63 = vadd.f32 %v621_v62, %v554_v61  ;;  %v1326_v0 = vpop.f32.mrb[3].mxu0 }
 0x1d8   : > { %1570 = vmatpush3.bf16.msra.mxu1 %v1567_v34  ;;  %1032 = vst [vmem:[%s1965_s25 + $0x19] sm:$0x1] %v622_v63 }
 0x1d9   : > { %1572 = vmatprep.subr.bf16.mxu1 %v1571_v37 }
 0x1dc   : > { %1574 = vmatpush3.bf16.msra.mxu1 %v1571_v37 }
 0x1dd   : > { %1576 = vmatprep.subr.bf16.mxu1 %v1575_v40 }
 0x1e0   : > { %1578 = vmatpush3.bf16.msra.mxu1 %v1575_v40 }
 0x1e1   : > { %1580 = vmatprep.subr.bf16.mxu1 %v1579_v43 }
 0x1e4   : > { %1582 = vmatpush3.bf16.msra.mxu1 %v1579_v43 }
 0x1e5   : > { %1584 = vmatprep.subr.bf16.mxu1 %v1583_v46 }
 0x1e8   : > { %1586 = vmatpush3.bf16.msra.mxu1 %v1583_v46 }
 0x1e9   : > { %1588 = vmatprep.subr.bf16.mxu1 %v1587_v49 }
 0x1ec   : > { %1590 = vmatpush3.bf16.msra.mxu1 %v1587_v49 }
 0x1ed   : > { %1592 = vmatprep.subr.bf16.mxu1 %v1591_v52 }
 0x1f0   : > { %1594 = vmatpush3.bf16.msra.mxu1 %v1591_v52 }
 0x1f3   : > { %1430 = vmatmul.mubr.f32.vlgmr.msra.gmra.mrb[6].mxu1 %v833_v54 }
 0x2a6   : > { %v718_v3 = vpop.f32.mrb[4].mxu1 }
 0x2a7   : > { %v719_v7 = vadd.f32 %v1130_v2, %v718_v3  ;;  %v1361_v8 = vpop.f32.mrb[5].mxu1 }
 0x2a9   : > { %v722_v9 = vmax.f32 %v719_v7, 0.0 }
 0x2ab   : > { %1395 = vmatmul.mubr.f32.vlgmr.msra.gmra.mrb[4].mxu0 %v722_v9 }
 0x2ac   : > { %1598 = vmatpush3.bf16.msra.mxu0 %v1595_v60 }
 0x2ad   : > { %1600 = vmatprep.subr.bf16.mxu0 %v1599_v1 }
 0x2b0   : > { %1602 = vmatpush3.bf16.msra.mxu0 %v1599_v1 }
 0x2b1   : > { %1604 = vmatprep.subr.bf16.mxu0 %v1603_v12 }
 0x2b4   : > { %1606 = vmatpush3.bf16.msra.mxu0 %v1603_v12 }
 0x2b5   : > { %1608 = vmatprep.subr.bf16.mxu0 %v1607_v15 }
 0x2b8   : > { %1610 = vmatpush3.bf16.msra.mxu0 %v1607_v15 }
 0x2b9   : > { %1612 = vmatprep.subr.bf16.mxu0 %v1611_v18 }
 0x2bc   : > { %1614 = vmatpush3.bf16.msra.mxu0 %v1611_v18 }
 0x2bd   : > { %1616 = vmatprep.subr.bf16.mxu0 %v1615_v23 }
 0x2c0   : > { %1618 = vmatpush3.bf16.msra.mxu0 %v1615_v23 }
 0x2c1   : > { %1620 = vmatprep.subr.bf16.mxu0 %v1619_v26 }
 0x2c4   : > { %1622 = vmatpush3.bf16.msra.mxu0 %v1619_v26 }
 0x2c5   : > { %1624 = vmatprep.subr.bf16.mxu0 %v1623_v28 }
 0x2c6   : > { %v1431_v30 = vpop.f32.mrb[6].mxu1 }
 0x2c7   : > { %v927_v31 = vadd.f32 %v1431_v30, %v1132_v29  ;;  %v921_v32 = vpop.f32.mrb[7].mxu1 }
 0x2c8   : > { %v922_v33 = vadd.f32 %v1132_v29, %v921_v32  ;;  %1626 = vmatpush3.bf16.msra.mxu0 %v1623_v28 }
 0x2c9   : > { %v931_v35 = vmax.f32 %v927_v31, 0.0 }
 0x2ca   : > { %v930_v34 = vmax.f32 %v922_v33, 0.0 }
 0x2cc   : > { %1464 = vmatprep.mubr.f32.mxu0 %v930_v34 }
 0x2cd   : > { %1465 = vmatmul.mubr.f32.vlgmr.msra.gmra.mrb[6].mxu0 %v931_v35 }
 0x37e   : > { %v810_v37 = vpop.f32.mrb[4].mxu0 }
 0x37f   : > { %v811_v38 = vadd.f32 %v1131_v36, %v810_v37  ;;  %v1396_v39 = vpop.f32.mrb[5].mxu0 }
 0x381   : > { %v816_v40 = vand.u32 2147483647, %v811_v38  ;;  %v815_v48 = vmax.f32 %v811_v38, 0.0  ;;  %vm814_vm7 = vcmp.gt.f32.partialorder %v811_v38, 20.0 }
 0x383   : > { %v817_v41 = vsub.f32 0.0, %v816_v40 }
 0x385   : > { %v818_v21 = vmul.f32 1.442695, %v817_v41 }
 0x387   : > { %1642 = vpow2.f32 %v818_v21 }
 0x391   : > { %v1643_v43 = vpop.eup %1642 }
 0x392   : > { %v820_v44 = vadd.f32 1.0, %v1643_v43 }
 0x394   : > { %1644 = vlog2.f32 %v820_v44 }
 0x39e   : > { %v1645_v46 = vpop.eup %1644 }
 0x39f   : > { %v822_v49 = vmul.f32 0.6931472, %v1645_v46 }
 0x3a0   : > { %v1466_v50 = vpop.f32.mrb[6].mxu0 }
 0x3a1   : > { %v823_v51 = vadd.f32 %v822_v49, %v815_v48  ;;  %v1025_v52 = vadd.f32 %v1466_v50, %v1133_v47  ;;  %v1019_v53 = vpop.f32.mrb[7].mxu0 }
 0x3a2   : > { %v1020_v54 = vadd.f32 %v1133_v47, %v1019_v53 }
 0x3a3   : > { %v824_v55 = vsel %vm814_vm7, %v811_v38, %v823_v51  ;;  %1030 = vst [vmem:[%s1965_s25 + $0x10] sm:$0xff] %v1025_v52 }
 0x3a4   : > { %v828_v56 = vsel %vm827_vm6, %v824_v55, %v811_v38  ;;  %1029 = vst [vmem:[%s1965_s25 + $0x8] sm:$0xff] %v1020_v54 }
 0x3a5   : > { %v829_v20 = vmul.f32 %v828_v56, %v1778_v42 }
 0x3a7   : > { %1028 = vst [vmem:[%s1965_s25] sm:$0xff] %v829_v20 }
 0x3a8 PF: > { %s14_s15 = sadd.s32 1, %s1652_s15  }
 0x3a9   : > { %p11_p4 = scmp.ge.s32.totalorder %s14_s15, 4  }
 0x3ab   :  { %13 = sbr.rel (!%p11_p4) target bundleno = 1 (0x1), region = 72 }

</bundles_post_ra>
